<compile_context>
chip_gen: v7x
topology: tpu7x:2x2x1
jax: 0.10.0
libtpu: 0.0.40
codegen_flags: <defaults>
</compile_context>

<pallas_src>
import functools

import jax
import jax.numpy as jnp
from jax import lax
from jax.experimental import pallas as pl
from jax.experimental.pallas import tpu as pltpu


# ----------------------------------------------------------------------------- kernel
def _fifb_kernel(TH, W,
                 x_ref,                               # (1, 1, Cin, (TH+2)*W) bf16
                 wab_ref, bab_ref,                    # (2Ch, Cin) bf16, (2Ch, 1) f32
                 wdw_ref, bdw_ref,                    # (Ch, 6) f32, (Ch, 2) f32
                 wc_ref, bc_ref,                      # (2Ch, 5Ch) bf16, (2Ch, 1) f32
                 wend_ref, bend_ref,                  # (2Ch, 4Ch) bf16, (2Ch, 1) f32
                 mask_ref,                            # (1, 4, TH*W) f32 {0,1}
                 o_ref):                              # (1, 2Ch, TH*W) f32
    PT = TH * W
    Ch2 = wab_ref.shape[0]
    Ch = Ch2 // 2

    x = x_ref[0, 0]                                   # (Cin, (TH+2)*W) bf16, halo'd tile

    # ---- conv_a | conv_b (fused 1x1) + ReLU over the halo'd tile (MXU) ---------------
    xab_full = jnp.dot(wab_ref[...], x,
                       preferred_element_type=jnp.float32) + bab_ref[...]
    xab_full = jnp.maximum(xab_full, 0.0)             # (2Ch, (TH+2)*W) f32

    # ---- precomputed {0,1} boundary masks (no div/mod in-kernel) ----------------------
    m = mask_ref[0]                                   # (4, PT)
    m_wp, m_wn = m[0:1], m[1:2]                       # w != 0 / w != W-1
    m_hp, m_hn = m[2:3], m[3:4]                       # image-top / image-bottom rows

    # ---- vertical ±1-row neighbours = plain lane slices thanks to the halo ------------
    xab   = xab_full[:, W:W + PT]                     # tile rows themselves
    xab_u = xab_full[:, 0:PT] * m_hp                  # value at (h-1, w); 0 above image
    xab_d = xab_full[:, 2 * W:2 * W + PT] * m_hn      # value at (h+1, w); 0 below image

    # ---- horizontal ±1 neighbours: one shared XLU roll per direction + w-border mask --
    xab_wm = pltpu.roll(xab, 1, axis=1) * m_wp        # value at (h, w-1)
    xab_wp = pltpu.roll(xab, PT - 1, axis=1) * m_wn   # value at (h, w+1)

    x1,    x2    = xab[:Ch],    xab[Ch:]              # conv_a / conv_b branches
    x1_wm, x2_wm = xab_wm[:Ch], xab_wm[Ch:]
    x1_wp, x2_wp = xab_wp[:Ch], xab_wp[Ch:]
    x1_hm, x2_hm = xab_u[:Ch],  xab_u[Ch:]
    x1_hp, x2_hp = xab_d[:Ch],  xab_d[Ch:]

    wdw = wdw_ref[...]                                # (Ch, 6) f32
    bdw = bdw_ref[...]                                # (Ch, 2) f32

    # ---- gc_13 / gc_31 depthwise taps + Hardtanh(0, 3)  (VPU) -------------------------
    x11 = jnp.clip(x1_wm * wdw[:, 0:1] + x1 * wdw[:, 1:2] + x1_wp * wdw[:, 2:3]
                   + bdw[:, 0:1], 0.0, 3.0)
    x12 = jnp.clip(x1_hm * wdw[:, 3:4] + x1 * wdw[:, 4:5] + x1_hp * wdw[:, 5:6]
                   + bdw[:, 1:2], 0.0, 3.0)

    # ---- c_13 | c_31 fused into one matmul over a 5-block stack (shared x2 center) ----
    xs = jnp.concatenate([x2_wm, x2, x2_wp, x2_hm, x2_hp],
                         axis=0).astype(jnp.bfloat16)               # (5Ch, PT)
    x2cat = jnp.maximum(
        jnp.dot(wc_ref[...], xs, preferred_element_type=jnp.float32) + bc_ref[...],
        0.0)                                                        # (2Ch, PT): [x21; x22]

    # ---- c_a_end | c_b_end fused (block-diag 1x1) -> final channel-concat + ReLU ------
    xe = jnp.concatenate([x11, x12, x2cat], axis=0).astype(jnp.bfloat16)   # (4Ch, PT)
    out = jnp.dot(wend_ref[...], xe, preferred_element_type=jnp.float32) + bend_ref[...]
    o_ref[0] = jnp.maximum(out, 0.0)                                # (2Ch, PT): [y1; y2]


# --------------------------------------------------------------------------- helpers
def _vmem_limit_bytes():
    """~48 MiB on v7x (64 MiB physical), ~96 MiB on v5e/v6e (128 MiB physical)."""
    try:
        cap = int(pltpu.get_tpu_info().vmem_capacity_bytes)
    except Exception:
        cap = 128 * 1024 * 1024
    return min(100 * 1024 * 1024, (cap * 3) // 4)


def _pick_tile_h(H, W, max_lanes=512):
    """Largest divisor of H whose flattened tile is lane-dense and <= max_lanes lanes."""
    divs = [d for d in range(1, H + 1) if H % d == 0]
    good = [d for d in divs if d * W <= max_lanes and (d == H or (d * W) % 128 == 0)]
    if good:
        return max(good)
    dense = [d for d in divs if d == H or (d * W) % 128 == 0]
    return min(dense) if dense else H


# ----------------------------------------------------------------------------- wrapper
@functools.partial(jax.jit, static_argnames=("tile_h",))
def fifb_block_pallas(x_nchw, params, tile_h=None):
    """x_nchw: (B, Cin, H, W) float32.  Returns (B, 2*Ch, H, W) float32."""
    B, Cin, H, W = x_nchw.shape
    Ch = params["conv_a_w"].shape[0]
    f32, bf16 = jnp.float32, jnp.bfloat16

    TH = _pick_tile_h(H, W) if tile_h is None else tile_h
    assert H % TH == 0, (H, TH)
    n_tiles = H // TH
    PT = TH * W                                   # lanes per output tile
    PH = (TH + 2) * W                             # lanes per halo'd input tile
    if n_tiles > 1:
        assert PT % 128 == 0, "tile_h * W must be a multiple of 128 when tiling H"

    # --- conv_a | conv_b fused 1x1 -----------------------------------------------------
    wab = jnp.concatenate([params["conv_a_w"][:, :, 0, 0],
                           params["conv_b_w"][:, :, 0, 0]], axis=0).astype(bf16)  # (2Ch, Cin)
    bab = jnp.concatenate([params["conv_a_b"],
                           params["conv_b_b"]])[:, None].astype(f32)              # (2Ch, 1)

    # --- depthwise taps packed: cols 0:3 -> gc_13 (W), cols 3:6 -> gc_31 (H) -----------
    wdw = jnp.concatenate([params["gc_13_w"][:, 0, 0, :],
                           params["gc_31_w"][:, 0, :, 0]], axis=1).astype(f32)    # (Ch, 6)
    bdw = jnp.stack([params["gc_13_b"], params["gc_31_b"]], axis=1).astype(f32)   # (Ch, 2)

    # --- c_13 | c_31 over the 5-block stack [x2_wm, x2, x2_wp, x2_hm, x2_hp] -----------
    w13 = params["c_13_w"][:, :, 0, :]            # (Ch, Ch, 3)  [co, ci, kw]
    w31 = params["c_31_w"][:, :, :, 0]            # (Ch, Ch, 3)  [co, ci, kh]
    zc = jnp.zeros((Ch, Ch), f32)
    wc = jnp.concatenate([
        jnp.concatenate([w13[..., 0], w13[..., 1], w13[..., 2], zc, zc], axis=1),
        jnp.concatenate([zc, w31[..., 1], zc, w31[..., 0], w31[..., 2]], axis=1)],
        axis=0).astype(bf16)                                                       # (2Ch, 5Ch)
    bc = jnp.concatenate([params["c_13_b"], params["c_31_b"]])[:, None].astype(f32)

    # --- c_a_end | c_b_end as one block-diagonal (2Ch, 4Ch) ----------------------------
    wae = params["c_a_end_w"][:, :, 0, 0]                                          # (Ch, 2Ch)
    wbe = params["c_b_end_w"][:, :, 0, 0]
    z2 = jnp.zeros((Ch, 2 * Ch), f32)
    wend = jnp.concatenate([jnp.concatenate([wae, z2], axis=1),
                            jnp.concatenate([z2, wbe], axis=1)], axis=0).astype(bf16)
    bend = jnp.concatenate([params["c_a_end_b"], params["c_b_end_b"]])[:, None].astype(f32)

    weight_args = [wab, bab, wdw, bdw, wc, bc, wend, bend]

    # --- input tiles with a 1-row halo (bf16: half the input HBM bytes) ----------------
    # TODO(synk): at production resolutions replace this materialized halo copy with a
    # manual-DMA halo (memory_space=pl.ANY + make_async_copy) to avoid the extra HBM pass.
    xp = jnp.pad(x_nchw.astype(bf16), ((0, 0), (0, 0), (1, 1), (0, 0)))            # (B,Cin,H+2,W)
    x_tiles = jnp.stack([xp[:, :, t * TH:t * TH + TH + 2, :] for t in range(n_tiles)],
                        axis=1).reshape(B, n_tiles, Cin, PH)                       # bf16

    # --- per-tile {0,1} boundary masks (built once; no div/mod inside the kernel) ------
    row_idx = jnp.arange(H, dtype=jnp.int32).reshape(n_tiles, TH)
    col_idx = jnp.arange(W, dtype=jnp.int32)
    m_w_prev = jnp.broadcast_to((col_idx != 0)[None, None, :], (n_tiles, TH, W))
    m_w_next = jnp.broadcast_to((col_idx != W - 1)[None, None, :], (n_tiles, TH, W))
    m_h_prev = jnp.broadcast_to((row_idx != 0)[:, :, None], (n_tiles, TH, W))
    m_h_next = jnp.broadcast_to((row_idx != H - 1)[:, :, None], (n_tiles, TH, W))
    masks = jnp.stack([m_w_prev, m_w_next, m_h_prev, m_h_next],
                      axis=1).reshape(n_tiles, 4, PT).astype(f32)

    in_specs = ([pl.BlockSpec((1, 1, Cin, PH), lambda b, t: (b, t, 0, 0))]
                + [pl.BlockSpec(w.shape, lambda b, t: (0, 0)) for w in weight_args]
                + [pl.BlockSpec((1, 4, PT), lambda b, t: (t, 0, 0))])
    out_specs = pl.BlockSpec((1, 2 * Ch, PT), lambda b, t: (b, 0, t))
    # Output kept f32 to match the reference exactly; use bf16 here to cut HBM traffic
    # by ~40% on v5e/v6e if the consumer accepts it.
    out_shape = jax.ShapeDtypeStruct((B, 2 * Ch, n_tiles * PT), f32)

    out_flat = pl.pallas_call(
        functools.partial(_fifb_kernel, TH, W),
        grid=(B, n_tiles),
        in_specs=in_specs,
        out_specs=out_specs,
        out_shape=out_shape,
        compiler_params=pltpu.CompilerParams(
            dimension_semantics=("parallel", "parallel"),   # batch AND row-tiles independent
            vmem_limit_bytes=_vmem_limit_bytes()),
    )(x_tiles, *weight_args, masks)

    return out_flat.reshape(B, 2 * Ch, H, W)


# --------------------------------------------------------------------- pure-JAX reference
def _conv2d_ref(x, w, b, groups=1):
    y = lax.conv_general_dilated(
        x, w, window_strides=(1, 1), padding="SAME",
        dimension_numbers=("NCHW", "OIHW", "NCHW"),
        feature_group_count=groups)
    return y + b[None, :, None, None]


def fifb_block_ref(x, p):
    hid = p["conv_a_w"].shape[0]
    x1 = jax.nn.relu(_conv2d_ref(x, p["conv_a_w"], p["conv_a_b"]))
    x2 = jax.nn.relu(_conv2d_ref(x, p["conv_b_w"], p["conv_b_b"]))
    x11 = jnp.clip(_conv2d_ref(x1, p["gc_13_w"], p["gc_13_b"], groups=hid), 0.0, 3.0)
    x12 = jnp.clip(_conv2d_ref(x1, p["gc_31_w"], p["gc_31_b"], groups=hid), 0.0, 3.0)
    x1c = jnp.concatenate([x11, x12], axis=1)
    x21 = jax.nn.relu(_conv2d_ref(x2, p["c_13_w"], p["c_13_b"]))
    x22 = jax.nn.relu(_conv2d_ref(x2, p["c_31_w"], p["c_31_b"]))
    x2c = jnp.concatenate([x21, x22], axis=1)
    y1 = jax.nn.relu(_conv2d_ref(x1c, p["c_a_end_w"], p["c_a_end_b"]))
    y2 = jax.nn.relu(_conv2d_ref(x2c, p["c_b_end_w"], p["c_b_end_b"]))
    return jnp.concatenate([y1, y2], axis=1)


# --------------------------------------------------------------------------------- main
def _init_params(key, in_ch, hid):
    shapes = {
        "conv_a_w": (hid, in_ch, 1, 1), "conv_a_b": (hid,),
        "conv_b_w": (hid, in_ch, 1, 1), "conv_b_b": (hid,),
        "gc_31_w": (hid, 1, 3, 1),      "gc_31_b": (hid,),
        "gc_13_w": (hid, 1, 1, 3),      "gc_13_b": (hid,),
        "c_31_w": (hid, hid, 3, 1),     "c_31_b": (hid,),
        "c_13_w": (hid, hid, 1, 3),     "c_13_b": (hid,),
        "c_a_end_w": (hid, 2 * hid, 1, 1), "c_a_end_b": (hid,),
        "c_b_end_w": (hid, 2 * hid, 1, 1), "c_b_end_b": (hid,),
    }
    keys = jax.random.split(key, len(shapes))
    return {name: 0.1 * jax.random.normal(k, shp, jnp.float32)
            for (name, shp), k in zip(shapes.items(), keys)}


if __name__ == "__main__":
    B, Cin, H, W = 2, 4, 16, 16
    HID = 8

    root = jax.random.PRNGKey(0)
    k_x, k_p = jax.random.split(root)
    params = _init_params(k_p, Cin, HID)
    x = jax.random.normal(k_x, (B, Cin, H, W), jnp.float32)   # NCHW, like PyTorch

    ref = fifb_block_ref(x, params)

    # tile_h=8 exercises the multi-tile + halo path (2 row-tiles, 128-lane blocks);
    # tile_h=16 is the single-tile path.
    for th in (8, 16):
        out = jax.block_until_ready(fifb_block_pallas(x, params, tile_h=th))
        assert out.shape == (B, 2 * HID, H, W), out.shape
        max_err = float(jnp.max(jnp.abs(out - ref)))
        # bf16 MXU operands with f32 accumulation -> loose-but-meaningful tolerance.
        assert max_err < 3e-2, f"tile_h={th}: mismatch vs reference: {max_err}"

    print("KERNEL_OK")
</pallas_src>

<mosaic_0001>
module attributes {stable_mosaic.version = 11 : i64} {
  func.func @_fifb_kernel(%arg0: i32, %arg1: i32, %arg2: memref<1x1x4x160xbf16, #tpu.memory_space<vmem>>, %arg3: memref<16x4xbf16, #tpu.memory_space<vmem>>, %arg4: memref<16x1xf32, #tpu.memory_space<vmem>>, %arg5: memref<8x6xf32, #tpu.memory_space<vmem>>, %arg6: memref<8x2xf32, #tpu.memory_space<vmem>>, %arg7: memref<16x40xbf16, #tpu.memory_space<vmem>>, %arg8: memref<16x1xf32, #tpu.memory_space<vmem>>, %arg9: memref<16x32xbf16, #tpu.memory_space<vmem>>, %arg10: memref<16x1xf32, #tpu.memory_space<vmem>>, %arg11: memref<1x4x128xf32, #tpu.memory_space<vmem>>, %arg12: memref<1x16x128xf32, #tpu.memory_space<vmem>>) attributes {dimension_semantics = [#tpu.dimension_semantics<parallel>, #tpu.dimension_semantics<parallel>], iteration_bounds = array<i64: 2, 2>, scalar_prefetch = 0 : i64, scratch_operands = 0 : i64, tpu.core_type = #tpu.core_type<tc>, window_params = [{transform_indices = @transform_0, window_bounds = array<i64: 1, 1, 4, 160>}, {pipeline_mode = #tpu.pipeline_mode<synchronous>, transform_indices = @transform_1, window_bounds = array<i64: 16, 4>}, {pipeline_mode = #tpu.pipeline_mode<synchronous>, transform_indices = @transform_2, window_bounds = array<i64: 16, 1>}, {pipeline_mode = #tpu.pipeline_mode<synchronous>, transform_indices = @transform_3, window_bounds = array<i64: 8, 6>}, {pipeline_mode = #tpu.pipeline_mode<synchronous>, transform_indices = @transform_4, window_bounds = array<i64: 8, 2>}, {pipeline_mode = #tpu.pipeline_mode<synchronous>, transform_indices = @transform_5, window_bounds = array<i64: 16, 40>}, {pipeline_mode = #tpu.pipeline_mode<synchronous>, transform_indices = @transform_6, window_bounds = array<i64: 16, 1>}, {pipeline_mode = #tpu.pipeline_mode<synchronous>, transform_indices = @transform_7, window_bounds = array<i64: 16, 32>}, {pipeline_mode = #tpu.pipeline_mode<synchronous>, transform_indices = @transform_8, window_bounds = array<i64: 16, 1>}, {transform_indices = @transform_9, window_bounds = array<i64: 1, 4, 128>}, {transform_indices = @transform_10, window_bounds = array<i64: 1, 16, 128>}]} {
    %c0 = arith.constant 0 : index
    %c0_0 = arith.constant 0 : index
    %c0_1 = arith.constant 0 : index
    %c0_2 = arith.constant 0 : index
    %0 = vector.load %arg2[%c0, %c0_0, %c0_1, %c0_2] : memref<1x1x4x160xbf16, #tpu.memory_space<vmem>>, vector<1x1x4x160xbf16>
    %1 = vector.shape_cast %0 : vector<1x1x4x160xbf16> to vector<4x160xbf16>
    %c0_3 = arith.constant 0 : index
    %c0_4 = arith.constant 0 : index
    %2 = vector.load %arg3[%c0_3, %c0_4] : memref<16x4xbf16, #tpu.memory_space<vmem>>, vector<16x4xbf16>
    %cst = arith.constant dense<0.000000e+00> : vector<16x160xf32>
    %3 = tpu.matmul %2, %1, %cst {dimension_numbers = #tpu.dot_dimension_numbers<[1], [0], [0], [1], [0, 0, 1, 1], [], []>} : vector<16x4xbf16>, vector<4x160xbf16>, vector<16x160xf32> -> vector<16x160xf32>
    %c0_5 = arith.constant 0 : index
    %c0_6 = arith.constant 0 : index
    %4 = vector.load %arg4[%c0_5, %c0_6] : memref<16x1xf32, #tpu.memory_space<vmem>>, vector<16x1xf32>
    %5 = vector.broadcast %4 : vector<16x1xf32> to vector<16x160xf32>
    %6 = arith.addf %3, %5 : vector<16x160xf32>
    %cst_7 = arith.constant 0.000000e+00 : f32
    %7 = vector.broadcast %cst_7 : f32 to vector<16x160xf32>
    %8 = arith.maximumf %6, %7 : vector<16x160xf32>
    %c0_8 = arith.constant 0 : index
    %c0_9 = arith.constant 0 : index
    %c0_10 = arith.constant 0 : index
    %9 = vector.load %arg11[%c0_8, %c0_9, %c0_10] : memref<1x4x128xf32, #tpu.memory_space<vmem>>, vector<1x4x128xf32>
    %10 = vector.shape_cast %9 : vector<1x4x128xf32> to vector<4x128xf32>
    %11 = vector.extract_strided_slice %10 {offsets = [0, 0], sizes = [1, 128], strides = [1, 1]} : vector<4x128xf32> to vector<1x128xf32>
    %12 = vector.extract_strided_slice %10 {offsets = [1, 0], sizes = [1, 128], strides = [1, 1]} : vector<4x128xf32> to vector<1x128xf32>
    %13 = vector.extract_strided_slice %10 {offsets = [2, 0], sizes = [1, 128], strides = [1, 1]} : vector<4x128xf32> to vector<1x128xf32>
    %14 = vector.extract_strided_slice %10 {offsets = [3, 0], sizes = [1, 128], strides = [1, 1]} : vector<4x128xf32> to vector<1x128xf32>
    %15 = vector.extract_strided_slice %8 {offsets = [0, 16], sizes = [16, 128], strides = [1, 1]} : vector<16x160xf32> to vector<16x128xf32>
    %16 = vector.extract_strided_slice %8 {offsets = [0, 0], sizes = [16, 128], strides = [1, 1]} : vector<16x160xf32> to vector<16x128xf32>
    %17 = vector.broadcast %13 : vector<1x128xf32> to vector<16x128xf32>
    %18 = arith.mulf %16, %17 : vector<16x128xf32>
    %19 = vector.extract_strided_slice %8 {offsets = [0, 32], sizes = [16, 128], strides = [1, 1]} : vector<16x160xf32> to vector<16x128xf32>
    %20 = vector.broadcast %14 : vector<1x128xf32> to vector<16x128xf32>
    %21 = arith.mulf %19, %20 : vector<16x128xf32>
    %c1_i32 = arith.constant 1 : i32
    %22 = tpu.dynamic_rotate %15 by %c1_i32 dim 1 : vector<16x128xf32>, i32 -> vector<16x128xf32>
    %23 = vector.broadcast %11 : vector<1x128xf32> to vector<16x128xf32>
    %24 = arith.mulf %22, %23 : vector<16x128xf32>
    %c127_i32 = arith.constant 127 : i32
    %25 = tpu.dynamic_rotate %15 by %c127_i32 dim 1 : vector<16x128xf32>, i32 -> vector<16x128xf32>
    %26 = vector.broadcast %12 : vector<1x128xf32> to vector<16x128xf32>
    %27 = arith.mulf %25, %26 : vector<16x128xf32>
    %28 = vector.extract_strided_slice %15 {offsets = [0, 0], sizes = [8, 128], strides = [1, 1]} : vector<16x128xf32> to vector<8x128xf32>
    %29 = vector.extract_strided_slice %15 {offsets = [8, 0], sizes = [8, 128], strides = [1, 1]} : vector<16x128xf32> to vector<8x128xf32>
    %30 = vector.extract_strided_slice %24 {offsets = [0, 0], sizes = [8, 128], strides = [1, 1]} : vector<16x128xf32> to vector<8x128xf32>
    %31 = vector.extract_strided_slice %24 {offsets = [8, 0], sizes = [8, 128], strides = [1, 1]} : vector<16x128xf32> to vector<8x128xf32>
    %32 = vector.extract_strided_slice %27 {offsets = [0, 0], sizes = [8, 128], strides = [1, 1]} : vector<16x128xf32> to vector<8x128xf32>
    %33 = vector.extract_strided_slice %27 {offsets = [8, 0], sizes = [8, 128], strides = [1, 1]} : vector<16x128xf32> to vector<8x128xf32>
    %34 = vector.extract_strided_slice %18 {offsets = [0, 0], sizes = [8, 128], strides = [1, 1]} : vector<16x128xf32> to vector<8x128xf32>
    %35 = vector.extract_strided_slice %18 {offsets = [8, 0], sizes = [8, 128], strides = [1, 1]} : vector<16x128xf32> to vector<8x128xf32>
    %36 = vector.extract_strided_slice %21 {offsets = [0, 0], sizes = [8, 128], strides = [1, 1]} : vector<16x128xf32> to vector<8x128xf32>
    %37 = vector.extract_strided_slice %21 {offsets = [8, 0], sizes = [8, 128], strides = [1, 1]} : vector<16x128xf32> to vector<8x128xf32>
    %c0_11 = arith.constant 0 : index
    %c0_12 = arith.constant 0 : index
    %38 = vector.load %arg5[%c0_11, %c0_12] : memref<8x6xf32, #tpu.memory_space<vmem>>, vector<8x6xf32>
    %c0_13 = arith.constant 0 : index
    %c0_14 = arith.constant 0 : index
    %39 = vector.load %arg6[%c0_13, %c0_14] : memref<8x2xf32, #tpu.memory_space<vmem>>, vector<8x2xf32>
    %40 = vector.extract_strided_slice %38 {offsets = [0, 0], sizes = [8, 1], strides = [1, 1]} : vector<8x6xf32> to vector<8x1xf32>
    %41 = vector.broadcast %40 : vector<8x1xf32> to vector<8x128xf32>
    %42 = arith.mulf %30, %41 : vector<8x128xf32>
    %43 = vector.extract_strided_slice %38 {offsets = [0, 1], sizes = [8, 1], strides = [1, 1]} : vector<8x6xf32> to vector<8x1xf32>
    %44 = vector.broadcast %43 : vector<8x1xf32> to vector<8x128xf32>
    %45 = arith.mulf %28, %44 : vector<8x128xf32>
    %46 = arith.addf %42, %45 : vector<8x128xf32>
    %47 = vector.extract_strided_slice %38 {offsets = [0, 2], sizes = [8, 1], strides = [1, 1]} : vector<8x6xf32> to vector<8x1xf32>
    %48 = vector.broadcast %47 : vector<8x1xf32> to vector<8x128xf32>
    %49 = arith.mulf %32, %48 : vector<8x128xf32>
    %50 = arith.addf %46, %49 : vector<8x128xf32>
    %51 = vector.extract_strided_slice %39 {offsets = [0, 0], sizes = [8, 1], strides = [1, 1]} : vector<8x2xf32> to vector<8x1xf32>
    %52 = vector.broadcast %51 : vector<8x1xf32> to vector<8x128xf32>
    %53 = arith.addf %50, %52 : vector<8x128xf32>
    %cst_15 = arith.constant 0.000000e+00 : f32
    %cst_16 = arith.constant 3.000000e+00 : f32
    %54 = vector.broadcast %cst_15 : f32 to vector<8x128xf32>
    %55 = arith.maximumf %54, %53 : vector<8x128xf32>
    %56 = vector.broadcast %cst_16 : f32 to vector<8x128xf32>
    %57 = arith.minimumf %56, %55 : vector<8x128xf32>
    %58 = vector.extract_strided_slice %38 {offsets = [0, 3], sizes = [8, 1], strides = [1, 1]} : vector<8x6xf32> to vector<8x1xf32>
    %59 = vector.broadcast %58 : vector<8x1xf32> to vector<8x128xf32>
    %60 = arith.mulf %34, %59 : vector<8x128xf32>
    %61 = vector.extract_strided_slice %38 {offsets = [0, 4], sizes = [8, 1], strides = [1, 1]} : vector<8x6xf32> to vector<8x1xf32>
    %62 = vector.broadcast %61 : vector<8x1xf32> to vector<8x128xf32>
    %63 = arith.mulf %28, %62 : vector<8x128xf32>
    %64 = arith.addf %60, %63 : vector<8x128xf32>
    %65 = vector.extract_strided_slice %38 {offsets = [0, 5], sizes = [8, 1], strides = [1, 1]} : vector<8x6xf32> to vector<8x1xf32>
    %66 = vector.broadcast %65 : vector<8x1xf32> to vector<8x128xf32>
    %67 = arith.mulf %36, %66 : vector<8x128xf32>
    %68 = arith.addf %64, %67 : vector<8x128xf32>
    %69 = vector.extract_strided_slice %39 {offsets = [0, 1], sizes = [8, 1], strides = [1, 1]} : vector<8x2xf32> to vector<8x1xf32>
    %70 = vector.broadcast %69 : vector<8x1xf32> to vector<8x128xf32>
    %71 = arith.addf %68, %70 : vector<8x128xf32>
    %cst_17 = arith.constant 0.000000e+00 : f32
    %cst_18 = arith.constant 3.000000e+00 : f32
    %72 = vector.broadcast %cst_17 : f32 to vector<8x128xf32>
    %73 = arith.maximumf %72, %71 : vector<8x128xf32>
    %74 = vector.broadcast %cst_18 : f32 to vector<8x128xf32>
    %75 = arith.minimumf %74, %73 : vector<8x128xf32>
    %76 = tpu.concatenate %31, %29, %33, %35, %37 in 0 : vector<8x128xf32>, vector<8x128xf32>, vector<8x128xf32>, vector<8x128xf32>, vector<8x128xf32> -> vector<40x128xf32>
    %77 = arith.truncf %76 : vector<40x128xf32> to vector<40x128xbf16>
    %c0_19 = arith.constant 0 : index
    %c0_20 = arith.constant 0 : index
    %78 = vector.load %arg7[%c0_19, %c0_20] : memref<16x40xbf16, #tpu.memory_space<vmem>>, vector<16x40xbf16>
    %cst_21 = arith.constant dense<0.000000e+00> : vector<16x128xf32>
    %79 = tpu.matmul %78, %77, %cst_21 {dimension_numbers = #tpu.dot_dimension_numbers<[1], [0], [0], [1], [0, 0, 1, 1], [], []>} : vector<16x40xbf16>, vector<40x128xbf16>, vector<16x128xf32> -> vector<16x128xf32>
    %c0_22 = arith.constant 0 : index
    %c0_23 = arith.constant 0 : index
    %80 = vector.load %arg8[%c0_22, %c0_23] : memref<16x1xf32, #tpu.memory_space<vmem>>, vector<16x1xf32>
    %81 = vector.broadcast %80 : vector<16x1xf32> to vector<16x128xf32>
    %82 = arith.addf %79, %81 : vector<16x128xf32>
    %cst_24 = arith.constant 0.000000e+00 : f32
    %83 = vector.broadcast %cst_24 : f32 to vector<16x128xf32>
    %84 = arith.maximumf %82, %83 : vector<16x128xf32>
    %85 = tpu.concatenate %57, %75, %84 in 0 : vector<8x128xf32>, vector<8x128xf32>, vector<16x128xf32> -> vector<32x128xf32>
    %86 = arith.truncf %85 : vector<32x128xf32> to vector<32x128xbf16>
    %c0_25 = arith.constant 0 : index
    %c0_26 = arith.constant 0 : index
    %87 = vector.load %arg9[%c0_25, %c0_26] : memref<16x32xbf16, #tpu.memory_space<vmem>>, vector<16x32xbf16>
    %cst_27 = arith.constant dense<0.000000e+00> : vector<16x128xf32>
    %88 = tpu.matmul %87, %86, %cst_27 {dimension_numbers = #tpu.dot_dimension_numbers<[1], [0], [0], [1], [0, 0, 1, 1], [], []>} : vector<16x32xbf16>, vector<32x128xbf16>, vector<16x128xf32> -> vector<16x128xf32>
    %c0_28 = arith.constant 0 : index
    %c0_29 = arith.constant 0 : index
    %89 = vector.load %arg10[%c0_28, %c0_29] : memref<16x1xf32, #tpu.memory_space<vmem>>, vector<16x1xf32>
    %90 = vector.broadcast %89 : vector<16x1xf32> to vector<16x128xf32>
    %91 = arith.addf %88, %90 : vector<16x128xf32>
    %cst_30 = arith.constant 0.000000e+00 : f32
    %92 = vector.broadcast %cst_30 : f32 to vector<16x128xf32>
    %93 = arith.maximumf %91, %92 : vector<16x128xf32>
    %c0_31 = arith.constant 0 : index
    %c0_32 = arith.constant 0 : index
    %c0_33 = arith.constant 0 : index
    %94 = vector.load %arg12[%c0_31, %c0_32, %c0_33] : memref<1x16x128xf32, #tpu.memory_space<vmem>>, vector<1x16x128xf32>
    %95 = vector.shape_cast %94 : vector<1x16x128xf32> to vector<16x128xf32>
    %96 = vector.shape_cast %93 : vector<16x128xf32> to vector<1x16x128xf32>
    tpu.vector_store %arg12[%c0_31, %c0_32, %c0_33], %96 {strides = array<i32>} : memref<1x16x128xf32, #tpu.memory_space<vmem>>, vector<1x16x128xf32>,
    return
  }
  func.func @transform_0(%arg0: i32, %arg1: i32) -> (i32, i32, i32, i32) {
    %c0_i32 = arith.constant 0 : i32
    %c0_i32_0 = arith.constant 0 : i32
    %c0_i32_1 = arith.constant 0 : i32
    return %arg0, %arg1, %c0_i32, %c0_i32_0 : i32, i32, i32, i32
  }
  func.func @transform_1(%arg0: i32, %arg1: i32) -> (i32, i32) {
    %c0_i32 = arith.constant 0 : i32
    %c0_i32_0 = arith.constant 0 : i32
    %c0_i32_1 = arith.constant 0 : i32
    return %c0_i32, %c0_i32_0 : i32, i32
  }
  func.func @transform_2(%arg0: i32, %arg1: i32) -> (i32, i32) {
    %c0_i32 = arith.constant 0 : i32
    %c0_i32_0 = arith.constant 0 : i32
    %c0_i32_1 = arith.constant 0 : i32
    return %c0_i32, %c0_i32_0 : i32, i32
  }
  func.func @transform_3(%arg0: i32, %arg1: i32) -> (i32, i32) {
    %c0_i32 = arith.constant 0 : i32
    %c0_i32_0 = arith.constant 0 : i32
    %c0_i32_1 = arith.constant 0 : i32
    return %c0_i32, %c0_i32_0 : i32, i32
  }
  func.func @transform_4(%arg0: i32, %arg1: i32) -> (i32, i32) {
    %c0_i32 = arith.constant 0 : i32
    %c0_i32_0 = arith.constant 0 : i32
    %c0_i32_1 = arith.constant 0 : i32
    return %c0_i32, %c0_i32_0 : i32, i32
  }
  func.func @transform_5(%arg0: i32, %arg1: i32) -> (i32, i32) {
    %c0_i32 = arith.constant 0 : i32
    %c0_i32_0 = arith.constant 0 : i32
    %c0_i32_1 = arith.constant 0 : i32
    return %c0_i32, %c0_i32_0 : i32, i32
  }
  func.func @transform_6(%arg0: i32, %arg1: i32) -> (i32, i32) {
    %c0_i32 = arith.constant 0 : i32
    %c0_i32_0 = arith.constant 0 : i32
    %c0_i32_1 = arith.constant 0 : i32
    return %c0_i32, %c0_i32_0 : i32, i32
  }
  func.func @transform_7(%arg0: i32, %arg1: i32) -> (i32, i32) {
    %c0_i32 = arith.constant 0 : i32
    %c0_i32_0 = arith.constant 0 : i32
    %c0_i32_1 = arith.constant 0 : i32
    return %c0_i32, %c0_i32_0 : i32, i32
  }
  func.func @transform_8(%arg0: i32, %arg1: i32) -> (i32, i32) {
    %c0_i32 = arith.constant 0 : i32
    %c0_i32_0 = arith.constant 0 : i32
    %c0_i32_1 = arith.constant 0 : i32
    return %c0_i32, %c0_i32_0 : i32, i32
  }
  func.func @transform_9(%arg0: i32, %arg1: i32) -> (i32, i32, i32) {
    %c0_i32 = arith.constant 0 : i32
    %c0_i32_0 = arith.constant 0 : i32
    %c0_i32_1 = arith.constant 0 : i32
    return %arg1, %c0_i32, %c0_i32_0 : i32, i32, i32
  }
  func.func @transform_10(%arg0: i32, %arg1: i32) -> (i32, i32, i32) {
    %c0_i32 = arith.constant 0 : i32
    %c0_i32_0 = arith.constant 0 : i32
    return %arg0, %c0_i32, %arg1 : i32, i32, i32
  }
}

</mosaic_0001>

<bundles_post_ra>
// kernel: fifb_block_pallas.1
= control target key start
LH: loop header
LB: loop body
LE: loop exit
PB: predicated region body
PF: predicated region fallthrough
CT: control target
= control target key end

     0   :  { %s2524_s0 = inlined_call_operand.hbm [shape: bf16[2,2,4,160], index: 0, kind: input, shape index: {}]   ;;  %s2525_s1 = inlined_call_operand.hbm [shape: bf16[16,4], index: 1, kind: input, shape index: {}]   ;;  %s2526_s2 = inlined_call_operand.hbm [shape: f32[16,1], index: 2, kind: input, shape index: {}]   ;;  %s2527_s3 = inlined_call_operand.hbm [shape: f32[8,6], index: 3, kind: input, shape index: {}]   ;;  %s2528_s4 = inlined_call_operand.hbm [shape: f32[8,2], index: 4, kind: input, shape index: {}]   ;;  %s2529_s5 = inlined_call_operand.hbm [shape: bf16[16,40], index: 5, kind: input, shape index: {}]   ;;  %s2530_s6 = inlined_call_operand.hbm [shape: f32[16,1], index: 6, kind: input, shape index: {}]   ;;  %s2531_s7 = inlined_call_operand.hbm [shape: bf16[16,32], index: 7, kind: input, shape index: {}]   ;;  %s2532_s8 = inlined_call_operand.hbm [shape: f32[16,1], index: 8, kind: input, shape index: {}]   ;;  %s2533_s9 = inlined_call_operand.hbm [shape: f32[2,4,128], index: 9, kind: input, shape index: {}]   ;;  %s2534_s10 = inlined_call_operand.hbm [shape: f32[2,16,256], index: 10, kind: output, shape index: {}]  }
   0x1   :  { %2551 = sst [smem:[#allocation33_spill]] %s2524_s0 }
   0x2   :  { %2552 = sst [smem:[#allocation34_spill]] %s2525_s1 }
   0x3   :  { %2553 = sst [smem:[#allocation35_spill]] %s2526_s2 }
   0x4   :  { %2554 = sst [smem:[#allocation36_spill]] %s2527_s3 }
   0x5   :  { %2555 = sst [smem:[#allocation37_spill]] %s2528_s4 }
   0x6   :  { %2556 = sst [smem:[#allocation38_spill]] %s2529_s5 }
   0x7   :  { %2557 = sst [smem:[#allocation39_spill]] %s2530_s6 }
   0x8   :  { %2558 = sst [smem:[#allocation40_spill]] %s2533_s9 }
   0x9   :  { %2559 = sst [smem:[#allocation41_spill]] %s2534_s10 }
   0xa   :  { %15 = vsyncpa [#allocation3], 0 }
   0xb   :  { %17 = vsyncpa [#allocation3 + $0x1], 0 }
   0xc   :  { %18 = vsyncpa [#allocation6], 0 }
   0xd   :  { %19 = vsyncpa [#allocation9], 0 }
   0xe   :  { %20 = vsyncpa [#allocation12], 0 }
   0xf   :  { %21 = vsyncpa [#allocation15], 0 }
  0x10   :  { %22 = vsyncpa [#allocation18], 0 }
  0x11   :  { %24 = vsyncpa [#allocation18 + $0x1], 0 }
  0x12   :  { %25 = vsyncpa [#allocation4], 0 }
  0x13   :  { %27 = vsyncpa [#allocation4 + $0x1], 0  ;;  %s1928_s13 = smov 0   ;;  %s1930_s14 = smov 0  }
  0x14   :  { %s1932_s15 = smov 0   ;;  %s1934_s16 = smov 0  }
  0x15   :  { %s1936_s17 = smov 0   ;;  %s1938_s18 = smov 0  }
  0x16   :  { %s1940_s19 = smov 0   ;;  %s1942_s20 = smov 0  }
  0x17   :  { %s1944_s21 = smov 0   ;;  %s1946_s22 = smov 0  }
  0x18   :  { %s1948_s23 = smov 0  }
  0x19 LB: > { %2560 = sst [smem:[#allocation27_spill]] %s1800_s13  ;;  %s2535_s24 = sadd.s32 4294967295, %s1840_s23   ;;  %s1840_s23 = sphi %s1948_s23, %s33_s23   ;;  %s1836_s22 = sphi %s1946_s22, %s2612_s22   ;;  %s1832_s21 = sphi %s1944_s21, %s2611_s21   ;;  %s1828_s20 = sphi %s1942_s20, %s2610_s20   ;;  %s1824_s19 = sphi %s1940_s19, %s2609_s19   ;;  %s1820_s18 = sphi %s1938_s18, %s2608_s18   ;;  %s1816_s17 = sphi %s1936_s17, %s2607_s17   ;;  %s1812_s16 = sphi %s1934_s16, %s2606_s16   ;;  %s1808_s15 = sphi %s1932_s15, %s2605_s15   ;;  %s1804_s14 = sphi %s1930_s14, %s2604_s14   ;;  %s1800_s13 = sphi %s1928_s13, %s2603_s13  }
  0x1a   : > { %2561 = sst [smem:[#allocation28_spill]] %s1804_s14  ;;  %p1123_p0 = scmp.ge.s32.totalorder %s1840_s23, 1 }
  0x1b   : > { %2562 = sst [smem:[#allocation29_spill]] %s1808_s15  ;;  %p1987_p1 = scmp.eq.s32.totalorder %s2535_s24, 0 }
  0x1c   : > { %2563 = sst [smem:[#allocation30_spill]] %s1824_s19  ;;  %p300_p2 = scmp.lt.s32.totalorder %s1840_s23, 5 }
  0x1d   : > { %2564 = sst [smem:[#allocation31_spill]] %s1828_s20  ;;  %s1842_s27 = smov [#allocation5]  }
  0x1e   : > { %s2565_s25 = scalar_select %p1987_p1, 1, 0 }
  0x1f   : > { %p1992_p3 = pnand %p1123_p0, %p300_p2  ;;  %s312_s28 = sshll.u32 %s1842_s27, 4  ;;  %s1996_s28 = int_to_ptr.vmem [resolvable:$true] %s312_s28 }
  0x20   : > { %s1843_s30 = smov [#allocation8]   ;;  %s1844_s12 = smov [#allocation11]  }
  0x21   : > { %s2566_s26 = scalar_select %p1992_p3, 1, 0 }
  0x22   : > { %p1227_p4 = pneg %p1992_p3  ;;  %s339_s11 = sshll.u32 %s1843_s30, 4  ;;  %s2006_s11 = int_to_ptr.vmem [resolvable:$true] %s339_s11 }
  0x23   : > { %2567 = sst [smem:[#allocation32_spill]] %s2566_s26  ;;  %s2008_s24 = sshll.u32 %s1844_s12, 4  ;;  %s361_s24 = int_to_ptr.vmem [resolvable:$true] %s2008_s24 }
  0x24   : > { %p2002_p5 = pnand %p1227_p4, %p1987_p1  ;;  %s2569_s1 = sld [smem:[#allocation34_spill]] }
  0x26   : > { %p2018_p7 = pneg %p2002_p5 }
  0x2a   : > { %s1414_s27 = scalar_lea.hbm %s2569_s1, 128 }
  0x2b   : > { %p1415_p6 = scmp.ne.s32.totalorder %s2569_s1, %s1414_s27  ;;  %p1421_p10 = scmp.lt.u32.totalorder %s1414_s27, %s2569_s1 }
  0x2d   : > { %p1417_p8 = pnand %p2018_p7, %p1415_p6 }
  0x2f   : > { %p1418_p9 = pneg %p1417_p8 }
  0x31   : > { %p1423_p11 = pnand %p1421_p10, %p1418_p9 }
  0x33   : > { %1426 = shalt.err (!%p1423_p11)
}
  0x34   : > { %s1427_s10 = scalar_lea.vmem %s1996_s28, 128  ;;  %p1435_p2 = scmp.lt.s32.totalorder %s1996_s28, %s1996_s28 }
  0x35   : > { %p1428_p12 = scmp.ne.s32.totalorder %s1996_s28, %s1427_s10  ;;  %p1436_p4 = scmp.lt.s32.totalorder %s1427_s10, %s1427_s10 }
  0x37   : > { %p1430_p13 = pnand %p1428_p12, %p2018_p7  ;;  %p1437_p6 = por %p1436_p4, %p1435_p2 }
  0x39   : > { %p1431_p0 = pneg %p1430_p13 }
  0x3b   : > { %p1438_p8 = pnand %p1437_p6, %p1431_p0 }
  0x3d   : > { %1441 = shalt.err (!%p1438_p8)
}
  0x3e   : > { %s1845_s19 = smov 64   ;;  %s1846_s20 = smov 4  }
  0x3f   : > { %1230 = dma.hbm_to_vmem [thread:$0]  (!%p2002_p5), %s2569_s1, 128, %s1996_s28, [#allocation6], %s1845_s19, %s1845_s19, %s1846_s20  }
  0x40   : > { %s2571_s3 = sld [smem:[#allocation36_spill]] }
  0x46   : > { %s1442_s10 = scalar_lea.hbm %s2571_s3, 128 }
  0x47   : > { %p1443_p9 = scmp.ne.s32.totalorder %s2571_s3, %s1442_s10  ;;  %p1449_p12 = scmp.lt.u32.totalorder %s1442_s10, %s2571_s3 }
  0x49   : > { %p1445_p10 = pnand %p1443_p9, %p2018_p7 }
  0x4b   : > { %p1446_p11 = pneg %p1445_p10 }
  0x4d   : > { %p1451_p13 = pnand %p1449_p12, %p1446_p11 }
  0x4f   : > { %1454 = shalt.err (!%p1451_p13)
}
  0x50   : > { %s1455_s28 = scalar_lea.vmem %s2006_s11, 128  ;;  %p1463_p6 = scmp.lt.s32.totalorder %s2006_s11, %s2006_s11 }
  0x51   : > { %p1456_p0 = scmp.ne.s32.totalorder %s2006_s11, %s1455_s28  ;;  %p1464_p8 = scmp.lt.s32.totalorder %s1455_s28, %s1455_s28 }
  0x53   : > { %p1458_p2 = pnand %p1456_p0, %p2018_p7  ;;  %p1465_p9 = por %p1464_p8, %p1463_p6 }
  0x55   : > { %p1459_p4 = pneg %p1458_p2 }
  0x57   : > { %p1466_p10 = pnand %p1465_p9, %p1459_p4 }
  0x59   : > { %1469 = shalt.err (!%p1466_p10)
}
  0x5a   : > { %1236 = dma.hbm_to_vmem [thread:$0]  (!%p2002_p5), %s2571_s3, 128, %s2006_s11, [#allocation9]  }
  0x5b   : > { %s2572_s5 = sld [smem:[#allocation38_spill]] }
  0x61   : > { %s1470_s26 = scalar_lea.hbm %s2572_s5, 128 }
  0x62   : > { %p1471_p11 = scmp.ne.s32.totalorder %s2572_s5, %s1470_s26  ;;  %p1477_p0 = scmp.lt.u32.totalorder %s1470_s26, %s2572_s5 }
  0x64   : > { %p1473_p12 = pnand %p1471_p11, %p2018_p7 }
  0x66   : > { %p1474_p13 = pneg %p1473_p12 }
  0x68   : > { %p1479_p2 = pnand %p1477_p0, %p1474_p13 }
  0x6a   : > { %1482 = shalt.err (!%p1479_p2)
}
  0x6b   : > { %s1483_s28 = scalar_lea.vmem %s361_s24, 128  ;;  %p1491_p9 = scmp.lt.s32.totalorder %s361_s24, %s361_s24 }
  0x6c   : > { %p1484_p4 = scmp.ne.s32.totalorder %s361_s24, %s1483_s28  ;;  %p1492_p10 = scmp.lt.s32.totalorder %s1483_s28, %s1483_s28 }
  0x6e   : > { %p1486_p6 = pnand %p1484_p4, %p2018_p7  ;;  %p1493_p3 = por %p1492_p10, %p1491_p9 }
  0x70   : > { %p1487_p8 = pneg %p1486_p6 }
  0x72   : > { %p1494_p1 = pnand %p1493_p3, %p1487_p8 }
  0x74   : > { %1497 = shalt.err (!%p1494_p1)
}
  0x75   : > { %1242 = dma.hbm_to_vmem [thread:$0]  (!%p2002_p5), %s2572_s5, 128, %s361_s24, [#allocation12], %s1845_s19, %s1845_s19, %s1846_s20  }
  0x76   : > { %s1847_s13 = smov [#allocation14]   ;;  %s1848_s15 = smov [#allocation7]  }
  0x77   : > { %s386_s14 = sshll.u32 %s1847_s13, 4  ;;  %s325_s26 = sshll.u32 %s1848_s15, 4  ;;  %s387_s14 = int_to_ptr.vmem [resolvable:$true] %s386_s14  ;;  %s326_s26 = int_to_ptr.vmem [resolvable:$true] %s325_s26 }
  0x78   : > { %s1498_s12 = scalar_lea.hbm %s2531_s7, 128 }
  0x79   : > { %p1499_p1 = scmp.ne.s32.totalorder %s2531_s7, %s1498_s12  ;;  %p1505_p12 = scmp.lt.u32.totalorder %s1498_s12, %s2531_s7 }
  0x7b   : > { %p1501_p3 = pnand %p1499_p1, %p2018_p7 }
  0x7d   : > { %p1502_p11 = pneg %p1501_p3 }
  0x7f   : > { %p1507_p13 = pnand %p1505_p12, %p1502_p11 }
  0x81   : > { %1510 = shalt.err (!%p1507_p13)
}
  0x82   : > { %s1511_s24 = scalar_lea.vmem %s387_s14, 128  ;;  %p1519_p6 = scmp.lt.s32.totalorder %s387_s14, %s387_s14 }
  0x83   : > { %p1512_p0 = scmp.ne.s32.totalorder %s387_s14, %s1511_s24  ;;  %p1520_p8 = scmp.lt.s32.totalorder %s1511_s24, %s1511_s24 }
  0x85   : > { %p1514_p2 = pnand %p1512_p0, %p2018_p7  ;;  %p1521_p9 = por %p1520_p8, %p1519_p6 }
  0x87   : > { %p1515_p4 = pneg %p1514_p2 }
  0x89   : > { %p1522_p10 = pnand %p1521_p9, %p1515_p4 }
  0x8b   : > { %1525 = shalt.err (!%p1522_p10)
}
  0x8c   : > { %1248 = dma.hbm_to_vmem [thread:$0]  (!%p2002_p5), %s2531_s7, 128, %s387_s14, [#allocation15], %s1845_s19, %s1845_s19, %s1846_s20  }
  0x8d   : > { %s2573_s2 = sld [smem:[#allocation35_spill]] }
  0x93   : > { %s1526_s27 = scalar_lea.hbm %s2573_s2, 256 }
  0x94   : > { %p1527_p1 = scmp.ne.s32.totalorder %s2573_s2, %s1526_s27  ;;  %p1533_p12 = scmp.lt.u32.totalorder %s1526_s27, %s2573_s2 }
  0x96   : > { %p1529_p3 = pnand %p1527_p1, %p2018_p7 }
  0x98   : > { %p1530_p11 = pneg %p1529_p3 }
  0x9a   : > { %p1535_p13 = pnand %p1533_p12, %p1530_p11 }
  0x9c   : > { %1538 = shalt.err (!%p1535_p13)
}
  0x9d   : > { %s1539_s11 = scalar_lea.vmem %s326_s26, 256  ;;  %p1547_p6 = scmp.lt.s32.totalorder %s326_s26, %s326_s26 }
  0x9e   : > { %p1540_p0 = scmp.ne.s32.totalorder %s326_s26, %s1539_s11  ;;  %p1548_p8 = scmp.lt.s32.totalorder %s1539_s11, %s1539_s11 }
  0xa0   : > { %p1542_p2 = pnand %p1540_p0, %p2018_p7  ;;  %p1549_p9 = por %p1548_p8, %p1547_p6 }
  0xa2   : > { %p1543_p4 = pneg %p1542_p2 }
  0xa4   : > { %p1550_p10 = pnand %p1549_p9, %p1543_p4 }
  0xa6   : > { %1553 = shalt.err (!%p1550_p10)
}
  0xa7   : > { %s1849_s19 = smov 128   ;;  %s1850_s20 = smov 8  }
  0xa8   : > { %1233 = dma.hbm_to_vmem [thread:$0]  (!%p2002_p5), %s2573_s2, 256, %s326_s26, [#allocation6], %s1849_s19, %s1849_s19, %s1850_s20  }
  0xa9   : > { %s1851_s1 = smov [#allocation10]   ;;  %s1852_s13 = smov [#allocation13]  }
  0xaa   : > { %s350_s0 = sshll.u32 %s1851_s1, 4  ;;  %s373_s15 = sshll.u32 %s1852_s13, 4  ;;  %s351_s0 = int_to_ptr.vmem [resolvable:$true] %s350_s0  ;;  %s374_s15 = int_to_ptr.vmem [resolvable:$true] %s373_s15 }
  0xab   : > { %s2574_s4 = sld [smem:[#allocation37_spill]] }
  0xb1   : > { %s1554_s12 = scalar_lea.hbm %s2574_s4, 128 }
  0xb2   : > { %p1555_p1 = scmp.ne.s32.totalorder %s2574_s4, %s1554_s12  ;;  %p1561_p12 = scmp.lt.u32.totalorder %s1554_s12, %s2574_s4 }
  0xb4   : > { %p1557_p3 = pnand %p1555_p1, %p2018_p7 }
  0xb6   : > { %p1558_p11 = pneg %p1557_p3 }
  0xb8   : > { %p1563_p13 = pnand %p1561_p12, %p1558_p11 }
  0xba   : > { %1566 = shalt.err (!%p1563_p13)
}
  0xbb   : > { %s1567_s26 = scalar_lea.vmem %s351_s0, 128  ;;  %p1575_p6 = scmp.lt.s32.totalorder %s351_s0, %s351_s0 }
  0xbc   : > { %p1568_p0 = scmp.ne.s32.totalorder %s351_s0, %s1567_s26  ;;  %p1576_p8 = scmp.lt.s32.totalorder %s1567_s26, %s1567_s26 }
  0xbe   : > { %p1570_p2 = pnand %p1568_p0, %p2018_p7  ;;  %p1577_p9 = por %p1576_p8, %p1575_p6 }
  0xc0   : > { %p1571_p4 = pneg %p1570_p2 }
  0xc2   : > { %p1578_p10 = pnand %p1577_p9, %p1571_p4 }
  0xc4   : > { %1581 = shalt.err (!%p1578_p10)
}
  0xc5   : > { %1239 = dma.hbm_to_vmem [thread:$0]  (!%p2002_p5), %s2574_s4, 128, %s351_s0, [#allocation9]  }
  0xc6   : > { %s2575_s6 = sld [smem:[#allocation39_spill]] }
  0xcc   : > { %s1582_s13 = scalar_lea.hbm %s2575_s6, 256 }
  0xcd   : > { %p1583_p1 = scmp.ne.s32.totalorder %s2575_s6, %s1582_s13  ;;  %p1589_p12 = scmp.lt.u32.totalorder %s1582_s13, %s2575_s6 }
  0xcf   : > { %p1585_p3 = pnand %p1583_p1, %p2018_p7 }
  0xd1   : > { %p1586_p11 = pneg %p1585_p3 }
  0xd3   : > { %p1591_p13 = pnand %p1589_p12, %p1586_p11 }
  0xd5   : > { %1594 = shalt.err (!%p1591_p13)
}
  0xd6   : > { %s1595_s28 = scalar_lea.vmem %s374_s15, 256  ;;  %p1603_p6 = scmp.lt.s32.totalorder %s374_s15, %s374_s15 }
  0xd7   : > { %p1596_p0 = scmp.ne.s32.totalorder %s374_s15, %s1595_s28  ;;  %p1604_p8 = scmp.lt.s32.totalorder %s1595_s28, %s1595_s28 }
  0xd9   : > { %p1598_p2 = pnand %p1596_p0, %p2018_p7  ;;  %p1605_p9 = por %p1604_p8, %p1603_p6 }
  0xdb   : > { %p1599_p4 = pneg %p1598_p2 }
  0xdd   : > { %p1606_p10 = pnand %p1605_p9, %p1599_p4 }
  0xdf   : > { %1609 = shalt.err (!%p1606_p10)
}
  0xe0   : > { %1245 = dma.hbm_to_vmem [thread:$0]  (!%p2002_p5), %s2575_s6, 256, %s374_s15, [#allocation12], %s1849_s19, %s1849_s19, %s1850_s20  }
  0xe1   : > { %s1853_s26 = smov [#allocation16]   ;;  %s1610_s1 = scalar_lea.hbm %s2532_s8, 256 }
  0xe2   : > { %s399_s14 = sshll.u32 %s1853_s26, 4  ;;  %p1611_p1 = scmp.ne.s32.totalorder %s2532_s8, %s1610_s1  ;;  %s400_s14 = int_to_ptr.vmem [resolvable:$true] %s399_s14 }
  0xe3   : > { %p1617_p12 = scmp.lt.u32.totalorder %s1610_s1, %s2532_s8 }
  0xe4   : > { %p1613_p3 = pnand %p1611_p1, %p2018_p7 }
  0xe6   : > { %p1614_p11 = pneg %p1613_p3 }
  0xe8   : > { %p1619_p13 = pnand %p1617_p12, %p1614_p11 }
  0xea   : > { %1622 = shalt.err (!%p1619_p13)
}
  0xeb   : > { %s1623_s15 = scalar_lea.vmem %s400_s14, 256  ;;  %p1631_p6 = scmp.lt.s32.totalorder %s400_s14, %s400_s14 }
  0xec   : > { %p1624_p0 = scmp.ne.s32.totalorder %s400_s14, %s1623_s15  ;;  %p1632_p8 = scmp.lt.s32.totalorder %s1623_s15, %s1623_s15 }
  0xee   : > { %p1626_p2 = pnand %p1624_p0, %p2018_p7  ;;  %p1633_p9 = por %p1632_p8, %p1631_p6 }
  0xf0   : > { %p1627_p4 = pneg %p1626_p2 }
  0xf2   : > { %p1634_p10 = pnand %p1633_p9, %p1627_p4 }
  0xf4   : > { %1637 = shalt.err (!%p1634_p10)
}
  0xf5   : > { %1251 = dma.hbm_to_vmem [thread:$0]  (!%p2002_p5), %s2532_s8, 256, %s400_s14, [#allocation15], %s1849_s19, %s1849_s19, %s1850_s20  }
  0xf6   : > { %s1122_s9 = sadd.s32 4294967294, %s1840_s23   ;;  %s42_s29 = sadd.s32 1, %s1832_s21 }
  0xf7   : > { %p43_p7 = scmp.ge.s32.totalorder %s42_s29, 2  ;;  %s45_s0 = sadd.s32 1, %s1836_s22 }
  0xf8   : > { %s54_s11 = sadd.s32 1, %s1820_s18  ;;  %p61_p1 = scmp.ne.s32.totalorder %s1820_s18, %s1816_s17 }
  0xf9   : > { %s2614_s29 = smov (%p43_p7, %s42_s29), 0  ;;  %s2616_s0 = smov (!%p43_p7, %s45_s0), %s1836_s22 }
  0xfa   : > { %s2200_s26 = ssub.s32 %s1832_s21, %s2614_s29  ;;  %p2547_p5 = scmp.eq.s32.totalorder %s1840_s23, 0 }
  0xfb   : > { %p47_p3 = scmp.ge.s32.totalorder %s2616_s0, 2  ;;  %p67_p11 = scmp.ne.s32.totalorder %s1816_s17, %s1812_s16 }
  0xfc   : > { %p2210_p12 = por %p2547_p5, %p61_p1  ;;  %p2577_p0 = scmp.ne.s32.totalorder %s2565_s25, 0 }
  0xfd   : > { %s2618_s0 = smov (%p47_p3, %s2616_s0), 0  ;;  %s2579_s14 = sadd.s32 4294967295, %s1840_s23  }
  0xfe   : > { %p2219_p2 = por %p2577_p0, %p67_p11  ;;  %p287_p4 = scmp.eq.s32.totalorder %s2579_s14, 3 }
  0xff   : > { %s49_s24 = ssub.s32 %s1836_s22, %s2618_s0  ;;  %p293_p6 = scmp.eq.s32.totalorder %s1122_s9, 3 }
 0x100   : > { %s2578_s20 = scalar_select %p2219_p2, 1, 0 }
 0x101   : > { %s51_s3 = sor.u32 %s2200_s26, %s49_s24  ;;  %p2231_p8 = por %p287_p4, %p61_p1 }
 0x102   : > { %p52_p9 = scmp.eq.s32.totalorder %s51_s3, 0  ;;  %p2235_p10 = por %p293_p6, %p67_p11 }
 0x103   : > { %s2580_s1 = scalar_select %p2231_p8, 1, 0 }
 0x104   : > { %s2581_s13 = scalar_select %p2235_p10, 1, 0 }
 0x105   : > { %p2546_p7 = scmp.lt.s32.totalorder %s1840_s23, 4  ;;  %s413_s27 = sand.u32 1, %s1820_s18  }
 0x106   : > { %s2242_s30 = scalar_select %p52_p9, %s1820_s18, %s54_s11  }
 0x107   : > { %s1133_s12 = sshll.u32 %s413_s27, 2  ;;  %s1134_s15 = sshll.u32 %s1832_s21, 1 }
 0x108   : > { %s1135_s10 = sshll.u32 %s1836_s22, 2  ;;  %s417_s28 = scalar_lea.vmem [#allocation2], %s1133_s12 }
 0x109   : > { %s427_s9 = sshll.u32 %s417_s28, 4  ;;  %s423_s14 = sadd.s32 %s1135_s10, %s1134_s15  ;;  %s2246_s9 = int_to_ptr.vmem [resolvable:$true] %s427_s9 }
 0x10a   : > { %s1136_s24 = sshll.u32 %s423_s14, 5  ;;  %p2252_p1 = pnand %p2546_p7, %p2210_p12 }
 0x10b   : > { %s2583_s5 = sld [smem:[#allocation33_spill]]  ;;  %s414_s12 = scalar_lea.sflag [#allocation3], %s413_s27 }
 0x10c   : > { %p1640_p11 = pneg %p2252_p1 }
 0x111   : > { %s2259_s11 = scalar_lea.hbm %s2583_s5, %s1136_s24  ;;  %s1643_s2 = scalar_lea.hbm %s2583_s5, 256 }
 0x112   : > { %s1638_s15 = scalar_lea.hbm %s2259_s11, 64  ;;  %p1644_p6 = scmp.lt.u32.totalorder %s2259_s11, %s2583_s5 }
 0x113   : > { %p1639_p3 = scmp.ne.s32.totalorder %s2259_s11, %s1638_s15  ;;  %p1645_p9 = scmp.lt.u32.totalorder %s1643_s2, %s1638_s15 }
 0x114   : > { %p1647_p5 = scmp.lt.u32.totalorder %s1638_s15, %s2259_s11 }
 0x115   : > { %p1641_p12 = pnand %p1640_p11, %p1639_p3  ;;  %p1646_p7 = por %p1645_p9, %p1644_p6 }
 0x117   : > { %p1642_p4 = pneg %p1641_p12  ;;  %p1648_p13 = por %p1647_p5, %p1646_p7 }
 0x119   : > { %p1649_p10 = pnand %p1648_p13, %p1642_p4 }
 0x11b   : > { %1652 = shalt.err (!%p1649_p10)
}
 0x11c   : > { %s1653_s27 = scalar_lea.vmem %s2246_s9, 64  ;;  %s1854_s14 = smov [#allocation2]  }
 0x11d   : > { %p1654_p3 = scmp.ne.s32.totalorder %s2246_s9, %s1653_s27  ;;  %s1658_s24 = sshll.u32 %s1854_s14, 4  ;;  %s1659_s24 = int_to_ptr.vmem [resolvable:$false] %s1658_s24 }
 0x11e   : > { %s1660_s19 = scalar_lea.vmem %s1659_s24, 128  ;;  %p1661_p2 = scmp.lt.s32.totalorder %s2246_s9, %s1659_s24 }
 0x11f   : > { %p1656_p12 = pnand %p1654_p3, %p1640_p11  ;;  %p1662_p6 = scmp.lt.s32.totalorder %s1660_s19, %s1653_s27 }
 0x121   : > { %p1657_p8 = pneg %p1656_p12  ;;  %p1663_p9 = por %p1662_p6, %p1661_p2 }
 0x123   : > { %p1664_p5 = pnand %p1663_p9, %p1657_p8 }
 0x125   : > { %1667 = shalt.err (!%p1664_p5)
}
 0x126   : > { %s2584_s15 = sld [smem:[#allocation29_spill]]  ;;  %s2585_s10 = sld [smem:[#allocation28_spill]] }
 0x127   : > { %s2586_s2 = sld [smem:[#allocation27_spill]]  ;;  %p2587_p2 = scmp.eq.s32.totalorder %s2200_s26, 0 }
 0x128   : > { %1255 = dma.hbm_to_vmem [thread:$0]  (!%p2252_p1), %s2259_s11, 64, %s2246_s9, %s414_s12  }
 0x129   : > { %p2588_p8 = scmp.eq.s32.totalorder %s1840_s23, 0  ;;  %s1138_s27 = sshll.u32 %s1832_s21, 6 }
 0x12a   : > { %s2590_s6 = sld [smem:[#allocation40_spill]]  ;;  %p2591_p1 = scmp.lt.s32.totalorder %s1840_s23, 4 }
 0x12c   : > { %s248_s4 = sadd.s32 1, %s2584_s15  ;;  %p255_p13 = scmp.ne.s32.totalorder %s2584_s15, %s2585_s10 }
 0x12d   : > { %s2292_s28 = scalar_select %p2587_p2, %s2584_s15, %s248_s4  }
 0x12e   : > { %p257_p10 = por %p255_p13, %p2588_p8  ;;  %p261_p7 = scmp.ne.s32.totalorder %s2585_s10, %s2586_s2 }
 0x12f   : > { %s434_s3 = sand.u32 1, %s2584_s15  }
 0x130   : > { %p2302_p11 = por %p261_p7, %p2577_p0  ;;  %s1137_s24 = sshll.u32 %s434_s3, 2 }
 0x131   : > { %s2309_s9 = scalar_lea.hbm %s2590_s6, %s1138_s27  ;;  %p2313_p4 = pnand %p2591_p1, %p257_p10 }
 0x132   : > { %s438_s11 = scalar_lea.vmem [#allocation17], %s1137_s24  ;;  %s435_s15 = scalar_lea.sflag [#allocation18], %s434_s3 }
 0x133   : > { %s445_s12 = sshll.u32 %s438_s11, 4  ;;  %s1668_s10 = scalar_lea.hbm %s2309_s9, 64  ;;  %s2317_s12 = int_to_ptr.vmem [resolvable:$true] %s445_s12 }
 0x134   : > { %p1669_p0 = scmp.ne.s32.totalorder %s2309_s9, %s1668_s10  ;;  %p1670_p3 = pneg %p2313_p4 }
 0x135   : > { %s1673_s4 = scalar_lea.hbm %s2590_s6, 128  ;;  %p1674_p9 = scmp.lt.u32.totalorder %s2309_s9, %s2590_s6 }
 0x136   : > { %p1671_p12 = pnand %p1670_p3, %p1669_p0  ;;  %p1675_p5 = scmp.lt.u32.totalorder %s1673_s4, %s1668_s10 }
 0x137   : > { %p1677_p2 = scmp.lt.u32.totalorder %s1668_s10, %s2309_s9 }
 0x138   : > { %p1672_p6 = pneg %p1671_p12  ;;  %p1676_p13 = por %p1675_p5, %p1674_p9 }
 0x13a   : > { %p1678_p8 = por %p1677_p2, %p1676_p13 }
 0x13c   : > { %p1679_p10 = pnand %p1678_p8, %p1672_p6 }
 0x13e   : > { %1682 = shalt.err (!%p1679_p10)
}
 0x13f   : > { %s1683_s3 = scalar_lea.vmem %s2317_s12, 64  ;;  %s1855_s24 = smov [#allocation17]  }
 0x140   : > { %p1684_p7 = scmp.ne.s32.totalorder %s2317_s12, %s1683_s3  ;;  %s1688_s11 = sshll.u32 %s1855_s24, 4  ;;  %s1689_s11 = int_to_ptr.vmem [resolvable:$false] %s1688_s11 }
 0x141   : > { %s1690_s5 = scalar_lea.vmem %s1689_s11, 128  ;;  %p1691_p12 = scmp.lt.s32.totalorder %s2317_s12, %s1689_s11 }
 0x142   : > { %p1686_p1 = pnand %p1684_p7, %p1670_p3  ;;  %p1692_p9 = scmp.lt.s32.totalorder %s1690_s5, %s1683_s3 }
 0x144   : > { %p1687_p0 = pneg %p1686_p1  ;;  %p1693_p5 = por %p1692_p9, %p1691_p12 }
 0x146   : > { %p1694_p13 = pnand %p1693_p5, %p1687_p0 }
 0x148   : > { %1697 = shalt.err (!%p1694_p13)
}
 0x149   : > { %1258 = dma.hbm_to_vmem [thread:$0]  (!%p2313_p4), %s2309_s9, 64, %s2317_s12, %s435_s15  }
 0x14a   : > { %s2593_s10 = sld [smem:[#allocation32_spill]] }
 0x150   : > { %p2594_p6 = scmp.ne.s32.totalorder %s2593_s10, 0 }
 0x151   : > { %s2347_s2 = sand.u32 (!%p2594_p6), 1, %s1816_s17   ;;  %p2595_p3 = scmp.ne.s32.totalorder (!%p2594_p6), %s2578_s20, 0 }
 0x152   : > { %454 = sbr.rel (%p2594_p6) target bundleno = 1361 (0x551), region = 60  ;;  %s1140_s4 = sshll.u32 (!%p2594_p6), %s2347_s2, 2 }
 0x153   : > { %s457_s27 = scalar_lea.sflag (!%p2594_p6), [#allocation3], %s2347_s2  ;;  %s460_s19 = scalar_lea.vmem (!%p2594_p6), [#allocation2], %s1140_s4 }
 0x159   : > { %1771 = dma.done.wait (%p2595_p3), %s457_s27, 64  }
 0x15a   : > { %1773 = vsyncadd (%p2595_p3), %s457_s27, 4294967232  ;;  %p2596_p2 = scmp.ne.s32.totalorder %s2565_s25, 0 }
 0x15c   : > { %1775 = dma.done.wait (%p2596_p2), [#allocation6], 384  }
 0x15d   : > { %1777 = vsyncadd (%p2596_p2), [#allocation6], 4294966912 }
 0x15e   : > { %1779 = dma.done.wait (%p2596_p2), [#allocation9], 256  }
 0x15f   : > { %1781 = vsyncadd (%p2596_p2), [#allocation9], 4294967040 }
 0x160   : > { %1783 = dma.done.wait (%p2596_p2), [#allocation12], 384  }
 0x161   : > { %1785 = vsyncadd (%p2596_p2), [#allocation12], 4294966912 }
 0x162   : > { %1787 = dma.done.wait (%p2596_p2), [#allocation15], 384  }
 0x163   : > { %1789 = vsyncadd (%p2596_p2), [#allocation15], 4294966912  ;;  %s2597_s20 = sld [smem:[#allocation28_spill]] }
 0x169   : > { %s497_s9 = sand.u32 1, %s2597_s20  }
 0x16a   : > { %s2372_s26 = sshll.u32 %s497_s9, 2  ;;  %s498_s12 = scalar_lea.sflag [#allocation18], %s497_s9 }
 0x16b   : > { %s501_s15 = scalar_lea.vmem [#allocation17], %s2372_s26 }
 0x16c   : > { %1791 = dma.done.wait (%p2302_p11), %s498_s12, 64  }
 0x16d   : > { %1793 = vsyncadd (%p2302_p11), %s498_s12, 4294967232  ;;  %v1856_v0 = vmov 0   ;;  %vm577_vm0 = vcmask 1041408   ;;  %v548_v4 = vld [vmem:[#allocation7 + $0x8] sm:$0xff]  ;;  %v1411_v5 = vld [vmem:[#allocation5] sm:$0xff]   ;;  %vm573_vm1 = vcmask 31744   ;;  %v632_v6 = vlaneseq }
 0x16e   : > { %616 = vmatprep.mubr.bf16.mxu0 %v1856_v0  ;;  %1397 = vset.pattern.permute.xlu0 %v1856_v0  ;;  %v1152_v1 = vld.sshfl [vmem:[%s460_s19] sm:$0x33 pattern:$0x76325410]  ;;  %v1857_v18 = vmov 1   ;;  %s1858_s25 = smov 112  }
 0x16f   : > { %1403 = vset.pattern.permute.xlu1 %v1856_v0  ;;  %v572_v2 = vcombine.high %v1152_v1, %v1152_v1  ;;  %v579_v3 = vsel %vm577_vm0, %v1152_v1, 0  ;;  %556 = vperm.xlu0 %1397, %v548_v4   ;;  %v633_v11 = vshrl.u32 %v632_v6, 7  ;;  %v631_v19 = vld [vmem:[%s501_s15] sm:$0xf]  ;;  %s1859_s14 = smov 32   ;;  %v1860_v21 = vmov 0.0  }
 0x170   : > { %1171 = vmatprep.subr.bf16.mxu1 %v1860_v21  ;;  %vm662_vm2 = vcmask 916480   ;;  %s1861_s3 = smov 127   ;;  %s1862_s24 = smov 1   ;;  %v547_v25 = vld [vmem:[#allocation7] sm:$0xff]  ;;  %v2399_v30 = vld [vmem:[#allocation8] sm:$0xff]  ;;  %v1864_v31 = vmov 4  }
 0x171   : > { %1153 = vmatprep.subr.msk.bf16.mxu0 %vm577_vm0, %v572_v2  ;;  %v640_v15 = vsub.s32 3, %v633_v11  ;;  %s1863_s11 = smov 96   ;;  %v1865_v32 = vmov 5   ;;  %vm1866_vm3 = vmmov 0   ;;  %v1867_v33 = vmov 3   ;;  %v1412_v53 = vld [vmem:[#allocation11] sm:$0xff]  }
 0x172   : > { %585 = vmatpush1.bf16.msra.mxu0 %v579_v3  ;;  %1177 = vmatprep.mubr.msk.bf16.mxu1 %vm1866_vm3, %v1860_v21  ;;  %v673_v34 = vsub.s32 0, %v633_v11  ;;  %v683_v35 = vsub.s32 1, %v633_v11  ;;  %v634_v36 = vsub.s32 2, %v633_v11  ;;  %vm756_vm4 = vcmask 785408   ;;  %v688_v60 = vld [vmem:[#allocation10] sm:$0xff]  ;;  %s2598_s5 = sld [smem:[#allocation31_spill]] }
 0x173   : > { %1404 = vset.pattern.permute.xlu0 %v1857_v18  ;;  %v641_v20 = vrot.slane %v631_v19, %v640_v15  ;;  %1181 = vmatprep.subr.bf16.mxu0 %v1860_v21  ;;  %vm801_vm5 = vcmask 1043456   ;;  %vm797_vm6 = vcmask 326656   ;;  %v1868_v59 = vmov 2   ;;  %s2599_s10 = sld [smem:[#allocation30_spill]]  ;;  %s1150_s4 = sshll.u32 %s2347_s2, 4 }
 0x174   : > { %v2407_v37 = vrot.slane %v631_v19, %v673_v34  ;;  %v2409_v38 = vrot.slane %v631_v19, %v683_v35  ;;  %v2411_v41 = vrot.slane %v631_v19, %v634_v36  ;;  %vm869_vm7 = vcmask 261120   ;;  %s542_s20 = scalar_lea.vmem [#allocation19], %s1150_s4  ;;  %p2601_p4 = scmp.ne.s32.totalorder %s2580_s1, 0 }
 0x175   : > { %1154 = vmatmul.mubr.msk.bf16.vlgmr.msra.gmra.mrb[0].mxu0 %vm573_vm1, %v1411_v5  ;;  %s933_s9 = sshll.u32 %s542_s20, 4  ;;  %s2456_s9 = int_to_ptr.vmem [resolvable:$true] %s933_s9 }
 0x176   : > { %1185 = vmatprep.mubr.msk.bf16.mxu0 %vm1866_vm3, %v1860_v21 }
 0x178   : > { %s1160_s27 = sshll.u32 %s2598_s5, 2 }
 0x179   : > { %s930_s19 = sadd.s32 %s2599_s10, %s1160_s27 }
 0x17a   : > { %s1161_s26 = sshll.u32 %s930_s19, 7 }
 0x1ee   : > { %v557_v8 = vpop.permute.xlu0 %556 }
 0x248   : > { %v2382_v7 = vpop.f32.mrb[0].mxu0 }
 0x249   : > { %v2384_v9 = vpop.f32.mrb[1].mxu0 }
 0x24a   : > { %v622_v10 = vpop.f32.mrb[2].mxu0 }
 0x24b   : > { %v623_v12 = vadd.f32 %v622_v10, %v557_v8  ;;  %v624_v13 = vpop.f32.mrb[3].mxu0 }
 0x24c   : > { %v625_v14 = vadd.f32 %v624_v13, %v557_v8 }
 0x24d   : > { %v629_v16 = vmax.f32 %v623_v12, 0.0  ;;  %v852_v12 = vld [vmem:[#allocation16] sm:$0xff] }
 0x24e   : > { %v630_v17 = vmax.f32 %v625_v14, 0.0  ;;  %v781_v14 = vld [vmem:[#allocation13 + $0x8] sm:$0xff] }
 0x24f   : > { %658 = vrot.lane.b32.xlu0 %v629_v16, %s1858_s25  ;;  %v637_v45 = vmul.f32 %v2411_v41, %v629_v16 }
 0x250   : > { %660 = vrot.lane.b32.xlu1 %v630_v17, %s1858_s25 }
 0x254   : > { %643 = vrot.lane.b32.xlu1 %v641_v20, %s1859_s14 }
 0x2c1   : > { %v659_v22 = vpop.permute.xlu0 %658 }
 0x2c2   : > { %v661_v23 = vpop.permute.xlu1 %660 }
 0x2c3   : > { %v664_v24 = vsel %vm662_vm2, %v659_v22, %v661_v23 }
 0x2c4   : > { %679 = vrot.lane.b32.xlu1 %v664_v24, %s1861_s3  ;;  %669 = vrot.lane.b32.xlu0 %v664_v24, %s1862_s24 }
 0x2c6   : > { %v2395_v26 = vpop.permute.xlu1 %643 }
 0x2c7   : > { %v648_v27 = vmul.f32 %v2395_v26, %v629_v16  ;;  %v649_v28 = vmul.f32 %v2395_v26, %v630_v17 }
 0x2c8   : > { %551 = vperm.xlu1 %1403, %v547_v25  }
 0x2c9   : > { %v1398_v29 = vpack.i.bf16 %v649_v28, %v648_v27 }
 0x2cb   : > { %1399 = vrot.lane.b32.xlu0 %v1398_v29, %s1863_s11 }
 0x2cc   : > { %1405 = vset.pattern.permute.xlu1 %v1864_v31 }
 0x2cd   : > { %730 = vperm.xlu1 %1405, %v2399_v30  }
 0x2cf   : > { %696 = vperm.xlu0 %1404, %v2399_v30  }
 0x2d1   : > { %1406 = vset.pattern.permute.xlu1 %v1865_v32 }
 0x2d2   : > { %745 = vperm.xlu1 %1406, %v2399_v30  }
 0x2d6   : > { %1407 = vset.pattern.permute.xlu1 %v1867_v33 }
 0x336   : > { %v680_v39 = vpop.permute.xlu1 %679  ;;  %v670_v40 = vpop.permute.xlu0 %669 }
 0x337   : > { %v676_v42 = vmul.f32 %v2407_v37, %v670_v40  ;;  %v686_v43 = vmul.f32 %v2409_v38, %v680_v39 }
 0x339   : > { %v775_v44 = vpack.c.bf16 %v664_v24, %v676_v42  ;;  %v776_v46 = vpack.c.bf16 %v637_v45, %v686_v43 }
 0x33b   : > { %1172 = vmatpush3.bf16.msra.mxu1 %v775_v44 }
 0x33c   : > { %1173 = vmatprep.subr.bf16.mxu1 %v1860_v21 }
 0x33d   : > { %v1400_v47 = vpop.permute.xlu0 %1399 }
 0x33e   : > { %v1402_v48 = vunpack.i.h.bf16 %v1400_v47  ;;  %v1401_v49 = vunpack.i.l.bf16 %v1400_v47 }
 0x33f   : > { %1174 = vmatpush3.bf16.msra.mxu1 %v776_v46 }
 0x340   : > { %1175 = vmatprep.subr.bf16.mxu1 %v1860_v21  ;;  %v773_v50 = vsel %vm756_vm4, %v1401_v49, %v1402_v48 }
 0x341   : > { %v777_v51 = vpack.c.bf16 %v773_v50, %v773_v50 }
 0x343   : > { %v803_v52 = vsel %vm801_vm5, %v777_v51, 0 }
 0x344   : > { %1176 = vmatpush3.bf16.msra.mxu1 %v803_v52 }
 0x347   : > { %v552_v54 = vpop.permute.xlu1 %551  ;;  %1178 = vmatmul.mubr.msk.bf16.vlgmr.msra.gmra.mrb[0].mxu1 %vm797_vm6, %v1412_v53 }
 0x348   : > { %v619_v55 = vadd.f32 %v2382_v7, %v552_v54  ;;  %v621_v56 = vadd.f32 %v2384_v9, %v552_v54  ;;  %v780_v9 = vld [vmem:[#allocation13] sm:$0xff] }
 0x34a   : > { %v2421_v57 = vmax.f32 %v619_v55, 0.0  ;;  %v628_v58 = vmax.f32 %v621_v56, 0.0 }
 0x34c   : > { %656 = vrot.lane.b32.xlu1 %v628_v58, %s1858_s25  ;;  %654 = vrot.lane.b32.xlu0 %v2421_v57, %s1858_s25  ;;  %v731_v61 = vpop.permute.xlu1 %730  ;;  %v646_v6 = vmul.f32 %v2395_v26, %v2421_v57  ;;  %v647_v11 = vmul.f32 %v2395_v26, %v628_v58  ;;  %v636_v36 = vmul.f32 %v2411_v41, %v2421_v57 }
 0x34d   : > { %v733_v5 = vmul.f32 %v731_v61, %v2421_v57  ;;  %v734_v10 = vmul.f32 %v731_v61, %v628_v58 }
 0x34e   : > { %v697_v62 = vpop.permute.xlu0 %696 }
 0x34f   : > { %v699_v4 = vmul.f32 %v697_v62, %v2421_v57  ;;  %v700_v8 = vmul.f32 %v697_v62, %v628_v58 }
 0x350   : > { %725 = vperm.xlu1 %1407, %v2399_v30  }
 0x351   : > { %v746_v63 = vpop.permute.xlu1 %745 }
 0x352   : > { %v748_v7 = vmul.f32 %v746_v63, %v646_v6  ;;  %v749_v13 = vmul.f32 %v746_v63, %v647_v11 }
 0x354   : > { %1408 = vset.pattern.permute.xlu1 %v1868_v59 }
 0x355   : > { %711 = vperm.xlu1 %1408, %v2399_v30  }
 0x359   : > { %1409 = vset.pattern.permute.xlu1 %v1856_v0 }
 0x35a   : > { %718 = vperm.xlu1 %1409, %v688_v60  }
 0x3be   : > { %v657_v1 = vpop.permute.xlu1 %656  ;;  %v655_v2 = vpop.permute.xlu0 %654 }
 0x3bf   : > { %v663_v3 = vsel %vm662_vm2, %v655_v2, %v657_v1 }
 0x3c0   : > { %677 = vrot.lane.b32.xlu1 %v663_v3, %s1861_s3  ;;  %667 = vrot.lane.b32.xlu0 %v663_v3, %s1862_s24  ;;  %s919_s3 = scalar_lea.sflag [#allocation4], %s2347_s2  ;;  %s1698_s24 = scalar_lea.vmem %s2456_s9, 256 }
 0x3c1   : > { %p1699_p11 = scmp.ne.s32.totalorder %s2456_s9, %s1698_s24 }
 0x3c3   : > { %p1700_p8 = pnand %p1699_p11, %p2601_p4 }
 0x3c4   : > { %703 = vrot.lane.b32.xlu1 %v699_v4, %s1858_s25  ;;  %761 = vperm.xlu0 %1404, %v688_v60   ;;  %v1413_v60 = vld [vmem:[#allocation14] sm:$0xff]  }
 0x3c5   : > { %p1701_p10 = pneg %p1700_p8 }
 0x3c8   : > { %737 = vrot.lane.b32.xlu1 %v733_v5, %s1858_s25  ;;  %1410 = vset.pattern.permute.xlu0 %v1856_v0  ;;  %v853_v0 = vld [vmem:[#allocation16 + $0x8] sm:$0xff] }
 0x3c9   : > { %691 = vperm.xlu0 %1410, %v2399_v30  }
 0x3cc   : > { %752 = vrot.lane.b32.xlu1 %v748_v7, %s1863_s11 }
 0x3cd   : > { %705 = vrot.lane.b32.xlu0 %v700_v8, %s1858_s25 }
 0x3cf   : > { %v726_v19 = vpop.permute.xlu1 %725 }
 0x3d0   : > { %784 = vperm.xlu1 %1409, %v780_v9   ;;  %v728_v44 = vmul.f32 %v726_v19, %v636_v36 }
 0x3d1   : > { %739 = vrot.lane.b32.xlu0 %v734_v10, %s1858_s25  ;;  %s2600_s25 = sld [smem:[#allocation41_spill]] }
 0x3d4   : > { %856 = vperm.xlu1 %1409, %v852_v12   ;;  %v712_v20 = vpop.permute.xlu1 %711 }
 0x3d5   : > { %754 = vrot.lane.b32.xlu0 %v749_v13, %s1863_s11  ;;  %s1869_s11 = smov [#allocation19]  }
 0x3d6   : > { %s1702_s5 = sshll.u32 %s1869_s11, 4  ;;  %s1703_s5 = int_to_ptr.vmem [resolvable:$false] %s1702_s5 }
 0x3d7   : > { %s2461_s14 = scalar_lea.hbm %s2600_s25, %s1161_s26  ;;  %s1704_s10 = scalar_lea.vmem %s1703_s5, 512 }
 0x3d8   : > { %861 = vperm.xlu1 %1409, %v853_v0   ;;  %p1705_p7 = scmp.lt.s32.totalorder %s2456_s9, %s1703_s5  ;;  %p1706_p1 = scmp.lt.s32.totalorder %s1704_s10, %s1698_s24 }
 0x3d9   : > { %789 = vperm.xlu0 %1410, %v781_v14   ;;  %v719_v22 = vpop.permute.xlu1 %718 }
 0x3da   : > { %p1707_p0 = por %p1706_p1, %p1705_p7 }
 0x3dc   : > { %p1708_p12 = pnand %p1707_p0, %p1701_p10 }
 0x41a   : > { %v839_v15 = vpop.f32.mrb[0].mxu1 }
 0x41b   : > { %v1179_v16 = vpop.f32.mrb[1].mxu1 }
 0x41c   : > { %v842_v17 = vpop.f32.mrb[2].mxu1 }
 0x41d   : > { %v1180_v18 = vpop.f32.mrb[3].mxu1 }
 0x432   : > { %v678_v23 = vpop.permute.xlu1 %677  ;;  %v668_v24 = vpop.permute.xlu0 %667 }
 0x433   : > { %v685_v28 = vmul.f32 %v2409_v38, %v678_v23  ;;  %v675_v29 = vmul.f32 %v2407_v37, %v668_v24 }
 0x435   : > { %v714_v34 = vmul.f32 %v712_v20, %v685_v28 }
 0x436   : > { %v704_v26 = vpop.permute.xlu1 %703 }
 0x43a   : > { %v738_v30 = vpop.permute.xlu1 %737 }
 0x43e   : > { %v753_v39 = vpop.permute.xlu1 %752 }
 0x443   : > { %v762_v25 = vpop.permute.xlu0 %761 }
 0x448   : > { %v692_v27 = vpop.permute.xlu0 %691 }
 0x449   : > { %v694_v31 = vmul.f32 %v692_v27, %v675_v29 }
 0x44c   : > { %v706_v32 = vpop.permute.xlu0 %705 }
 0x44d   : > { %v707_v33 = vsel %vm662_vm2, %v704_v26, %v706_v32 }
 0x44e   : > { %v709_v35 = vadd.f32 %v707_v33, %v694_v31 }
 0x44f   : > { %v785_v38 = vpop.permute.xlu1 %784 }
 0x450   : > { %v715_v40 = vadd.f32 %v714_v34, %v709_v35  ;;  %v740_v42 = vpop.permute.xlu0 %739  ;;  %v840_v49 = vadd.f32 %v839_v15, %v785_v38 }
 0x451   : > { %v741_v43 = vsel %vm662_vm2, %v738_v30, %v740_v42 }
 0x452   : > { %v721_v45 = vadd.f32 %v719_v22, %v715_v40  ;;  %v743_v46 = vadd.f32 %v741_v43, %v728_v44  ;;  %v846_v54 = vmax.f32 %v840_v49, 0.0 }
 0x453   : > { %v857_v61 = vpop.permute.xlu1 %856 }
 0x454   : > { %v755_v37 = vpop.permute.xlu0 %754  ;;  %v722_v50 = vmax.f32 %v721_v45, 0.0 }
 0x455   : > { %v757_v47 = vsel %vm756_vm4, %v753_v39, %v755_v37 }
 0x456   : > { %v759_v48 = vadd.f32 %v757_v47, %v743_v46  ;;  %v723_v56 = vmin.f32 %v722_v50, 3.0 }
 0x457   : > { %v862_v2 = vpop.permute.xlu1 %861 }
 0x458   : > { %v764_v51 = vadd.f32 %v762_v25, %v759_v48  ;;  %v790_v52 = vpop.permute.xlu0 %789 }
 0x459   : > { %v843_v41 = vadd.f32 %v842_v17, %v790_v52 }
 0x45a   : > { %v765_v53 = vmax.f32 %v764_v51, 0.0 }
 0x45b   : > { %v847_v55 = vmax.f32 %v843_v41, 0.0 }
 0x45c   : > { %v766_v57 = vmin.f32 %v765_v53, 3.0 }
 0x45d   : > { %v849_v58 = vpack.c.bf16 %v847_v55, %v846_v54 }
 0x45e   : > { %v848_v59 = vpack.c.bf16 %v766_v57, %v723_v56 }
 0x460   : > { %1182 = vmatpush3.bf16.msra.mxu0 %v848_v59 }
 0x461   : > { %1183 = vmatprep.subr.bf16.mxu0 %v1860_v21 }
 0x464   : > { %1184 = vmatpush3.bf16.msra.mxu0 %v849_v58 }
 0x467   : > { %1186 = vmatmul.mubr.msk.bf16.vlgmr.msra.gmra.mrb[4].mxu0 %vm869_vm7, %v1413_v60 }
 0x53a   : > { %v907_v62 = vpop.f32.mrb[4].mxu0 }
 0x53b   : > { %v908_v63 = vadd.f32 %v907_v62, %v857_v61  ;;  %v1187_v1 = vpop.f32.mrb[5].mxu0 }
 0x53c   : > { %v910_v3 = vpop.f32.mrb[6].mxu0 }
 0x53d   : > { %v914_v4 = vmax.f32 %v908_v63, 0.0  ;;  %v911_v21 = vadd.f32 %v910_v3, %v862_v2  ;;  %v1188_v5 = vpop.f32.mrb[7].mxu0 }
 0x53f   : > { %916 = vst [vmem:[%s542_s20] sm:$0xff] %v914_v4  ;;  %v915_v6 = vmax.f32 %v911_v21, 0.0 }
 0x541   : > { %917 = vst [vmem:[%s542_s20 + $0x8] sm:$0xff] %v915_v6 }
 0x542   : > { %1711 = shalt.err (!%p1708_p12)
}
 0x543   : > { %s1712_s4 = scalar_lea.hbm %s2461_s14, 256  ;;  %s1716_s20 = scalar_lea.hbm %s2600_s25, 1024 }
 0x544   : > { %p1713_p9 = scmp.ne.s32.totalorder %s2461_s14, %s1712_s4  ;;  %p1717_p6 = scmp.lt.u32.totalorder %s2461_s14, %s2600_s25 }
 0x545   : > { %p1718_p3 = scmp.lt.u32.totalorder %s1716_s20, %s1712_s4  ;;  %p1720_p11 = scmp.lt.u32.totalorder %s1712_s4, %s2461_s14 }
 0x546   : > { %p1714_p5 = pnand %p1713_p9, %p2601_p4 }
 0x547   : > { %p1719_p2 = por %p1718_p3, %p1717_p6 }
 0x548   : > { %p1715_p13 = pneg %p1714_p5 }
 0x549   : > { %p1721_p8 = por %p1720_p11, %p1719_p2 }
 0x54b   : > { %p1722_p10 = pnand %p1721_p8, %p1715_p13 }
 0x54d   : > { %1725 = shalt.err (!%p1722_p10)
}
 0x54e   : > { %s1870_s15 = smov 128   ;;  %s1871_s24 = smov 256  }
 0x54f   : > { %s1872_s11 = smov 8  }
 0x550   : > { %1225 = dma.vmem_to_hbm [thread:$0]  (%p2601_p4), %s2456_s9, 256, %s2461_s14, %s919_s3, %s1870_s15, %s1871_s24, %s1872_s11  }
 0x551 PF: > { %p1280_p7 = scmp.ge.s32.totalorder %s1840_s23, 2  ;;  %s948_s5 = sand.u32 1, %s1812_s16  }
 0x552   : > { %p2602_p1 = scmp.ne.s32.totalorder %s2581_s13, 0  ;;  %s949_s10 = scalar_lea.sflag [#allocation4], %s948_s5 }
 0x554   : > { %p1260_p0 = pnand %p1280_p7, %p2602_p1 }
 0x556   : > { %1795 = dma.done.wait (!%p1260_p0), %s949_s10, 256  }
 0x557   : > { %1797 = vsyncadd (!%p1260_p0), %s949_s10, 4294967040  ;;  %s33_s23 = sadd.s32 1, %s1840_s23   ;;  %s2603_s13 = sld [smem:[#allocation28_spill]] }
 0x558   : > { %p30_p12 = scmp.ge.s32.totalorder %s33_s23, 6   ;;  %s2604_s14 = sld [smem:[#allocation29_spill]] }
 0x559   : > { %s2605_s15 = smov %s2292_s28  ;;  %s2606_s16 = smov %s1816_s17 }
 0x55a   : > { %s2607_s17 = smov %s1820_s18  ;;  %s2608_s18 = smov %s2242_s30 }
 0x55b   : > { %s2609_s19 = smov %s1832_s21  ;;  %s2610_s20 = smov %s1836_s22 }
 0x55c   : > { %s2611_s21 = smov %s2614_s29  ;;  %s2612_s22 = smov %s2618_s0 }
 0x55d   :  { %32 = sbr.rel (!%p30_p12) target bundleno = 25 (0x19), region = 150 }
 0x564   :  { %954 = vsyncpa [#allocation3], 1 }
 0x565   :  { %956 = vsyncpa [#allocation3 + $0x1], 1 }
 0x566   :  { %957 = vsyncpa [#allocation6], 1 }
 0x567   :  { %958 = vsyncpa [#allocation9], 1 }
 0x568   :  { %959 = vsyncpa [#allocation12], 1 }
 0x569   :  { %960 = vsyncpa [#allocation15], 1 }
 0x56a   :  { %961 = vsyncpa [#allocation18], 1 }
 0x56b   :  { %963 = vsyncpa [#allocation18 + $0x1], 1 }
 0x56c   :  { %964 = vsyncpa [#allocation4], 1 }
 0x56d   :  { %966 = vsyncpa [#allocation4 + $0x1], 1 }

</bundles_post_ra>
